<compile_context>
chip_gen: v6e
topology: v6e:2x2x1
jax: 0.10.0
libtpu: 0.0.40
codegen_flags: <defaults>
</compile_context>

<pallas_src>
import math
import functools

import numpy as np
import jax
import jax.numpy as jnp
from jax.experimental import pallas as pl
from jax.experimental.pallas import tpu as pltpu


# ----------------------------------------------------------------------------
# Hardware-aware sizing helpers
# ----------------------------------------------------------------------------
@functools.lru_cache(maxsize=1)
def _vmem_config():
    """Return (vmem_limit_bytes, tile_budget_bytes) derived from the TPU generation."""
    cap = None
    try:
        cap = getattr(pltpu.get_tpu_info(), "vmem_capacity_bytes", None)
    except Exception:
        cap = None
    if cap is None or cap <= 64 * 1024 * 1024:
        # v7x-class (64 MiB per TensorCore) or unknown -> conservative sizing.
        return 36 * 1024 * 1024, 28 * 1024 * 1024
    # v5e / v6e: 128 MiB physical VMEM -> stream in as few, as-large steps as possible.
    return 96 * 1024 * 1024, 80 * 1024 * 1024


def _pick_lane(L):
    """Largest 'nice' lane width (multiple of 128) dividing L; prefer >=8 sublane rows."""
    cands = (2048, 1024, 512, 256, 128)
    for lane in cands:
        if L % lane == 0 and L // lane >= 8:
            return lane
    for lane in cands:
        if L % lane == 0:
            return lane
    return None


def _choose_row_tile(R, bytes_per_row, budget_bytes, min_steps=1):
    """Sublane rows per grid step: multiple of 8, double-buffered fit, balanced split.

    bytes_per_row = total bytes streamed (all inputs + outputs) per spatial row.
    min_steps>=2 is used at B==1 so a 'parallel' axis can shard across v7x's 2 TCs.
    """
    if R <= 8:
        return R
    max_rows = budget_bytes // (2 * max(bytes_per_row, 1))   # 2x: double-buffered
    max_rows = max(8, (max_rows // 8) * 8)
    n_steps = max(min_steps, math.ceil(R / max_rows))
    if n_steps <= 1:
        return R
    tr = math.ceil(R / n_steps)
    tr = min(max(8, math.ceil(tr / 8) * 8), max_rows)
    if tr >= R:
        return R
    return tr


# ----------------------------------------------------------------------------
# Kernel 1: _render_normal_map hot path.
#   With camera_vector = [0,0,1]:
#     render_mask = any(nm != 0); out = clip(nm_z * mask, 0, 1) == clip(nm_z, 0, 1)
#   (if nm_z == 0 the output is 0 either way), so only the z channel is streamed.
# ----------------------------------------------------------------------------
def _normal_z_kernel(z_ref, out_ref):
    out_ref[...] = jnp.clip(z_ref[...], 0.0, 1.0)         # (TR, LANE) dense tile


def _normal_fallback_kernel(nm_ref, out_ref):
    out_ref[...] = jnp.clip(nm_ref[2:3, :], 0.0, 1.0)     # (3, L) -> (1, L)


def render_normal_map(normal_map):
    """normal_map: (B, 3, H, W) -> (B, 1, H, W), same semantics as the torch code."""
    B, C, H, W = normal_map.shape
    assert C == 3
    L = H * W
    limit, budget = _vmem_config()
    itemsize = np.dtype(normal_map.dtype).itemsize
    lane = _pick_lane(L)

    if lane is None:
        # TODO(synk): odd (non-128-divisible) spatial sizes take the untiled path.
        nm = normal_map.reshape(B, C, L)
        out = pl.pallas_call(
            _normal_fallback_kernel,
            out_shape=jax.ShapeDtypeStruct((B, 1, L), normal_map.dtype),
            grid=(B,),
            in_specs=[pl.BlockSpec((None, C, L), lambda b: (b, 0, 0))],
            out_specs=pl.BlockSpec((None, 1, L), lambda b: (b, 0, 0)),
            compiler_params=pltpu.CompilerParams(
                dimension_semantics=("parallel",), vmem_limit_bytes=limit),
        )(nm)
        return out.reshape(B, 1, H, W)

    R = L // lane
    min_steps = 2 if B == 1 else 1
    # streams per spatial row: z-channel input + output
    TR = _choose_row_tile(R, bytes_per_row=2 * lane * itemsize,
                          budget_bytes=budget, min_steps=min_steps)
    nm = normal_map.reshape(B, C, R, lane)                 # free contiguous reshape
    out = pl.pallas_call(
        _normal_z_kernel,
        out_shape=jax.ShapeDtypeStruct((B, R, lane), normal_map.dtype),
        grid=(B, pl.cdiv(R, TR)),
        # channel dim squeezed; index_map picks channel 2 -> only z is DMA'd.
        in_specs=[pl.BlockSpec((None, None, TR, lane), lambda b, r: (b, 2, r, 0))],
        out_specs=pl.BlockSpec((None, TR, lane), lambda b, r: (b, r, 0)),
        compiler_params=pltpu.CompilerParams(
            dimension_semantics=("parallel", "parallel"), vmem_limit_bytes=limit),
    )(nm)
    return out.reshape(B, 1, H, W)


# ----------------------------------------------------------------------------
# Kernel 2: decode(copy_input_part=True) texture blend.
#   ntexture = (1 - mask) * decoded + mask * src_ntexture
#   mask == src_ntexture[:, -2:-1]  -> read in-kernel, no third DMA stream.
# ----------------------------------------------------------------------------
def _blend_kernel(dec_ref, src_ref, out_ref):
    d = dec_ref[...]                       # (C, TR, LANE)  or  (C, L) on fallback
    s = src_ref[...]
    m = s[-2:-1]                           # mask channel (C-2), broadcasts over C
    out_ref[...] = d + m * (s - d)         # == (1 - m) * d + m * s


def blend_textures(decoded, src_ntexture):
    """decoded/src: (B, C, H, W) -> (B, C, H, W); mask is channel C-2 of src."""
    assert decoded.shape == src_ntexture.shape
    B, C, H, W = decoded.shape
    L = H * W
    limit, budget = _vmem_config()
    itemsize = np.dtype(decoded.dtype).itemsize
    lane = _pick_lane(L)

    if lane is None:
        # TODO(synk): fallback keeps C on the sublane axis (padded); only hit for
        # non-128-divisible spatial sizes.
        dec = decoded.reshape(B, C, L)
        src = src_ntexture.reshape(B, C, L)
        out = pl.pallas_call(
            _blend_kernel,
            out_shape=jax.ShapeDtypeStruct((B, C, L), decoded.dtype),
            grid=(B,),
            in_specs=[pl.BlockSpec((None, C, L), lambda b: (b, 0, 0)),
                      pl.BlockSpec((None, C, L), lambda b: (b, 0, 0))],
            out_specs=pl.BlockSpec((None, C, L), lambda b: (b, 0, 0)),
            compiler_params=pltpu.CompilerParams(
                dimension_semantics=("parallel",), vmem_limit_bytes=limit),
        )(dec, src)
        return out.reshape(B, C, H, W)

    R = L // lane
    min_steps = 2 if B == 1 else 1
    # streams per spatial row: decoded + src + out, each C channels wide.
    TR = _choose_row_tile(R, bytes_per_row=3 * C * lane * itemsize,
                          budget_bytes=budget, min_steps=min_steps)
    dec = decoded.reshape(B, C, R, lane)
    src = src_ntexture.reshape(B, C, R, lane)
    out = pl.pallas_call(
        _blend_kernel,
        out_shape=jax.ShapeDtypeStruct((B, C, R, lane), decoded.dtype),
        grid=(B, pl.cdiv(R, TR)),
        in_specs=[pl.BlockSpec((None, C, TR, lane), lambda b, r: (b, 0, r, 0)),
                  pl.BlockSpec((None, C, TR, lane), lambda b, r: (b, 0, r, 0))],
        out_specs=pl.BlockSpec((None, C, TR, lane), lambda b, r: (b, 0, r, 0)),
        compiler_params=pltpu.CompilerParams(
            dimension_semantics=("parallel", "parallel"), vmem_limit_bytes=limit),
    )(dec, src)
    return out.reshape(B, C, H, W)


# ----------------------------------------------------------------------------
# NeuralRenderer forward (the in-script-implementable part of encode + decode)
# ----------------------------------------------------------------------------
class NeuralRendererPallas:
    """Pallas port of NeuralRenderer's forward-pass math.

    # TODO(synk): encoder / generator / rasterizer / renderer / compress_branch
    #             (VQGAN) are config-instantiated nets with unknown shapes.
    # TODO(synk): sample_values_by_uv + cv2.erode/blur (numpy/CPU ops) in the
    #             encode / test_phase mask paths are not translated.
    """

    def __init__(self, test_phase=False):
        self.test_phase = test_phase

    def _render_normal_map(self, data_dict):
        # 'raw_normal_map' stands in for self.normal_rasterizer(verts, verts_normals).
        # NOTE: the simplified z-only kernel is exact ONLY while camera_vector == [0,0,1].
        data_dict["normal_map"] = render_normal_map(data_dict["raw_normal_map"])
        return data_dict

    def encode(self, data_dict):
        data_dict = self._render_normal_map(data_dict)
        data_dict["src_ntexture"] = data_dict["ntexture"]
        # The original also stores texture_mask = ntexture[:, -2:-1]; the blend kernel
        # reads that mask channel in-VMEM instead of materializing it.
        # TODO(synk): compress_branch(data_dict, compress_only=True) not modeled;
        # 'decoded' is supplied directly as the stand-in for compress->decode.
        return data_dict

    def decode(self, data_dict, copy_input_part=True):
        decoded = data_dict["decoded"]
        if copy_input_part:
            # TODO(synk): test_phase cv2.erode/blur mask refinement not translated.
            data_dict["diffusion_ntexture"] = decoded
            # dict-completeness only: NOT fed to the kernel (kernel reads the mask
            # channel directly from the src stream; no extra DMA on the hot path).
            data_dict["mask"] = data_dict["src_ntexture"][:, -2:-1]
            data_dict["ntexture"] = blend_textures(decoded, data_dict["src_ntexture"])
        else:
            data_dict["ntexture"] = decoded
        return data_dict

    def forward(self, data_dict):
        data_dict = self.encode(data_dict)
        data_dict = self.decode(data_dict, copy_input_part=True)
        return data_dict


# ----------------------------------------------------------------------------
# Pure-JAX references (for correctness check)
# ----------------------------------------------------------------------------
def _ref_normal_map(nm):
    render_mask = jnp.sum((nm != 0).astype(jnp.float32), axis=1, keepdims=True) > 0
    cam = jnp.array([0.0, 0.0, 1.0], jnp.float32).reshape(1, 3, 1, 1)
    x = nm * cam
    x = x * render_mask.astype(nm.dtype)
    x = jnp.sum(x, axis=1, keepdims=True)
    return jnp.clip(x, 0.0, 1.0)


def _ref_blend(decoded, src, mask):
    return (1.0 - mask) * decoded + mask * src


if __name__ == "__main__":
    key = jax.random.PRNGKey(0)
    k1, k2, k3, k4 = jax.random.split(key, 4)

    B, H, W = 2, 16, 16
    C_TEX = 8  # neural texture channels (channel -2 acts as the mask channel)

    # Rasterized normal map (B, 3, H, W) with some exact-zero (background) pixels.
    raw_nm = jax.random.normal(k1, (B, 3, H, W), jnp.float32)
    bg = jax.random.uniform(k2, (B, 1, H, W)) < 0.3
    raw_nm = jnp.where(bg, 0.0, raw_nm)

    src_ntexture = jax.random.normal(k3, (B, C_TEX, H, W), jnp.float32)
    mask_chan = (jax.random.uniform(k4, (B, 1, H, W)) > 0.5).astype(jnp.float32)
    src_ntexture = src_ntexture.at[:, -2:-1].set(mask_chan)
    decoded = jax.random.normal(jax.random.PRNGKey(1), (B, C_TEX, H, W), jnp.float32)

    data_dict = {
        "raw_normal_map": raw_nm,
        "ntexture": src_ntexture,
        "decoded": decoded,
    }

    model = NeuralRendererPallas(test_phase=False)
    out = model.forward(data_dict)
    jax.block_until_ready(out["ntexture"])
    jax.block_until_ready(out["normal_map"])

    # correctness vs pure-JAX reference
    np.testing.assert_allclose(
        np.asarray(out["normal_map"]), np.asarray(_ref_normal_map(raw_nm)),
        rtol=1e-6, atol=1e-6)
    np.testing.assert_allclose(
        np.asarray(out["ntexture"]),
        np.asarray(_ref_blend(decoded, src_ntexture, src_ntexture[:, -2:-1])),
        rtol=1e-6, atol=1e-6)

    print("KERNEL_OK")
</pallas_src>

<mosaic_0001>
module attributes {stable_mosaic.version = 11 : i64} {
  func.func @_normal_z_kernel(%arg0: i32, %arg1: i32, %arg2: memref<1x1x1x256xf32, #tpu.memory_space<vmem>>, %arg3: memref<1x1x256xf32, #tpu.memory_space<vmem>>) attributes {dimension_semantics = [#tpu.dimension_semantics<parallel>, #tpu.dimension_semantics<parallel>], iteration_bounds = array<i64: 2, 1>, scalar_prefetch = 0 : i64, scratch_operands = 0 : i64, tpu.core_type = #tpu.core_type<tc>, window_params = [{transform_indices = @transform_0, window_bounds = array<i64: 1, 1, 1, 256>}, {transform_indices = @transform_1, window_bounds = array<i64: 1, 1, 256>}]} {
    %c0 = arith.constant 0 : index
    %c0_0 = arith.constant 0 : index
    %c0_1 = arith.constant 0 : index
    %c0_2 = arith.constant 0 : index
    %0 = vector.load %arg2[%c0, %c0_0, %c0_1, %c0_2] : memref<1x1x1x256xf32, #tpu.memory_space<vmem>>, vector<1x1x1x256xf32>
    %1 = vector.shape_cast %0 : vector<1x1x1x256xf32> to vector<1x256xf32>
    %cst = arith.constant 0.000000e+00 : f32
    %cst_3 = arith.constant 1.000000e+00 : f32
    %2 = vector.broadcast %cst : f32 to vector<1x256xf32>
    %3 = arith.maximumf %2, %1 : vector<1x256xf32>
    %4 = vector.broadcast %cst_3 : f32 to vector<1x256xf32>
    %5 = arith.minimumf %4, %3 : vector<1x256xf32>
    %c0_4 = arith.constant 0 : index
    %c0_5 = arith.constant 0 : index
    %c0_6 = arith.constant 0 : index
    %6 = vector.load %arg3[%c0_4, %c0_5, %c0_6] : memref<1x1x256xf32, #tpu.memory_space<vmem>>, vector<1x1x256xf32>
    %7 = vector.shape_cast %6 : vector<1x1x256xf32> to vector<1x256xf32>
    %8 = vector.shape_cast %5 : vector<1x256xf32> to vector<1x1x256xf32>
    tpu.vector_store %arg3[%c0_4, %c0_5, %c0_6], %8 {strides = array<i32>} : memref<1x1x256xf32, #tpu.memory_space<vmem>>, vector<1x1x256xf32>,
    return
  }
  func.func @transform_0(%arg0: i32, %arg1: i32) -> (i32, i32, i32, i32) {
    %c2_i32 = arith.constant 2 : i32
    %c0_i32 = arith.constant 0 : i32
    %c0_i32_0 = arith.constant 0 : i32
    return %arg0, %c2_i32, %arg1, %c0_i32 : i32, i32, i32, i32
  }
  func.func @transform_1(%arg0: i32, %arg1: i32) -> (i32, i32, i32) {
    %c0_i32 = arith.constant 0 : i32
    %c0_i32_0 = arith.constant 0 : i32
    return %arg0, %arg1, %c0_i32 : i32, i32, i32
  }
}

</mosaic_0001>

<bundles_post_ra>
// kernel: tpu_custom_call.1
= control target key start
LH: loop header
LB: loop body
LE: loop exit
PB: predicated region body
PF: predicated region fallthrough
CT: control target
= control target key end

     0   :  { %6 = vsyncpa [#allocation3], 0  ;;  %s592_s0 = inlined_call_operand.hbm [shape: f32[2,3,1,256], index: 0, kind: input, shape index: {}]   ;;  %s593_s1 = inlined_call_operand.hbm [shape: f32[2,1,256], index: 1, kind: output, shape index: {}]  }
   0x1   :  { %8 = vsyncpa [#allocation3 + $0x1], 0 }
   0x2   :  { %9 = vsyncpa [#allocation4], 0 }
   0x3   :  { %11 = vsyncpa [#allocation4 + $0x1], 0  ;;  %s462_s6 = smov 0   ;;  %s464_s7 = smov 0  }
   0x4   :  { %s466_s8 = smov 0   ;;  %s468_s9 = smov 0  }
   0x5   :  { %s470_s10 = smov 0   ;;  %s472_s11 = smov 0  }
   0x6 LB: > { %s262_s12 = sadd.s32 4294967295, %s448_s11   ;;  %s263_s13 = sadd.s32 4294967294, %s448_s11   ;;  %s448_s11 = sphi %s472_s11, %s17_s11   ;;  %s444_s10 = sphi %s470_s10, %s605_s10   ;;  %s440_s9 = sphi %s468_s9, %s604_s9   ;;  %s436_s8 = sphi %s466_s8, %s603_s8   ;;  %s432_s7 = sphi %s464_s7, %s602_s7   ;;  %s428_s6 = sphi %s462_s6, %s601_s6  }
   0x7   : > { %s29_s14 = sadd.s32 1, %s444_s10  ;;  %s38_s15 = sadd.s32 1, %s436_s8 }
   0x8   : > { %p31_p0 = scmp.ge.s32.totalorder %s29_s14, 2  ;;  %p45_p1 = scmp.ne.s32.totalorder %s436_s8, %s432_s7 }
   0x9   : > { %p46_p2 = scmp.eq.s32.totalorder %s448_s11, 0  ;;  %p51_p3 = scmp.ne.s32.totalorder %s432_s7, %s428_s6 }
   0xa   : > { %s607_s14 = smov (%p31_p0, %s29_s14), 0  ;;  %p52_p5 = scmp.eq.s32.totalorder %s262_s12, 0 }
   0xb   : > { %p503_p4 = por %p46_p2, %p45_p1  ;;  %s33_s17 = ssub.s32 %s444_s10, %s607_s14 }
   0xc   : > { %p77_p6 = scmp.eq.s32.totalorder %s262_s12, 1  ;;  %p36_p7 = scmp.eq.s32.totalorder %s33_s17, 0 }
   0xd   : > { %p509_p8 = por %p52_p5, %p51_p3  ;;  %p83_p10 = scmp.eq.s32.totalorder %s263_s13, 1 }
   0xe   : > { %p513_p9 = por %p77_p6, %p45_p1  ;;  %p289_p13 = scmp.lt.s32.totalorder %s448_s11, 2 }
   0xf   : > { %s518_s20 = scalar_select %p36_p7, %s436_s8, %s38_s15  }
  0x10   : > { %p520_p11 = por %p83_p10, %p51_p3  ;;  %s103_s22 = sand.u32 1, %s436_s8  }
  0x11   : > { %s266_s23 = sshll.u32 %s103_s22, 1  ;;  %s267_s24 = smul.u32 96, %s444_s10 }
  0x12   : > { %s597_s21 = scalar_select %p520_p11, 1, 0 }
  0x13   : > { %s107_s25 = scalar_lea.vmem [#allocation2], %s266_s23  ;;  %p530_p0 = pnand %p289_p13, %p503_p4 }
  0x14   : > { %s118_s26 = sshll.u32 %s107_s25, 4  ;;  %s208_s30 = scalar_lea.hbm %s592_s0, %s267_s24  ;;  %s119_s26 = int_to_ptr.vmem [resolvable:$true] %s118_s26 }
  0x15   : > { %s209_s2 = scalar_lea.hbm %s208_s30, 64  ;;  %s104_s3 = scalar_lea.sflag [#allocation3], %s103_s22 }
  0x16   : > { %p341_p1 = pneg %p530_p0  ;;  %s352_s4 = scalar_lea.vmem %s119_s26, 32 }
  0x17   : > { %p353_p2 = scmp.ne.s32.totalorder %s119_s26, %s352_s4  ;;  %s450_s5 = smov [#allocation2]  }
  0x18   : > { %s357_s12 = sshll.u32 %s450_s5, 4  ;;  %s358_s12 = int_to_ptr.vmem [resolvable:$false] %s357_s12 }
  0x19   : > { %p355_p3 = pnand %p353_p2, %p341_p1  ;;  %s359_s13 = scalar_lea.vmem %s358_s12, 64 }
  0x1a   : > { %p360_p4 = scmp.lt.s32.totalorder %s119_s26, %s358_s12  ;;  %p361_p6 = scmp.lt.s32.totalorder %s359_s13, %s352_s4 }
  0x1b   : > { %p356_p5 = pneg %p355_p3 }
  0x1c   : > { %p362_p7 = por %p361_p6, %p360_p4 }
  0x1e   : > { %p363_p10 = pnand %p362_p7, %p356_p5 }
  0x20   : > { %366 = shalt.err (!%p363_p10)
}
  0x21   : > { %284 = dma.hbm_to_vmem [thread:$0]  (!%p530_p0), %s209_s2, 32, %s119_s26, %s104_s3  }
  0x22   : > { %p268_p13 = scmp.ge.s32.totalorder %s448_s11, 1  ;;  %p123_p12 = scmp.lt.s32.totalorder %s448_s11, 3 }
  0x24   : > { %p124_p11 = pnand %p268_p13, %p123_p12 }
  0x25   : > { %s544_s15 = sand.u32 (!%p124_p11), 1, %s432_s7  }
  0x26   : > { %127 = sbr.rel (%p124_p11) target bundleno = 68 (0x44), region = 24  ;;  %s269_s16 = sshll.u32 (!%p124_p11), %s544_s15, 1 }
  0x27   : > { %s130_s17 = scalar_lea.sflag (!%p124_p11), [#allocation3], %s544_s15  ;;  %s133_s22 = scalar_lea.vmem (!%p124_p11), [#allocation2], %s269_s16 }
  0x2b   : > { %419 = dma.done.wait (%p509_p8), %s130_s17, 32  }
  0x2c   : > { %421 = vsyncadd (%p509_p8), %s130_s17, 4294967264  ;;  %v155_v0 = vlaneseq  ;;  %v152_v1 = vld [vmem:[%s133_s22] sm:$0x3]  ;;  %s151_s23 = scalar_lea.vmem [#allocation5], %s269_s16  ;;  %s276_s25 = sshll.u32 %s440_s9, 5 }
  0x2d   : > { %s177_s24 = sshll.u32 %s151_s23, 4  ;;  %v153_v2 = vmax.f32 %v152_v1, 0.0  ;;  %s175_s28 = scalar_lea.hbm %s593_s1, %s276_s25  ;;  %s178_s24 = int_to_ptr.vmem [resolvable:$true] %s177_s24 }
  0x2e   : > { %vm157_vm0 = vcmp.lt.s32.totalorder %v155_v0, 256  ;;  %s161_s29 = scalar_lea.sflag [#allocation4], %s544_s15  ;;  %s368_s18 = scalar_lea.vmem %s178_s24, 32 }
  0x2f   : > { %v154_v3 = vmin.f32 %v153_v2, 1.0  ;;  %p369_p8 = scmp.ne.s32.totalorder %s178_s24, %s368_s18  ;;  %s451_s30 = smov [#allocation5]  }
  0x30   : > { %s372_s2 = sshll.u32 %s451_s30, 4  ;;  %s373_s2 = int_to_ptr.vmem [resolvable:$false] %s372_s2 }
  0x31   : > { %159 = vst.msk [vmem:[%s151_s23] sm:$0x3] %vm157_vm0, %v154_v3  ;;  %p370_p11 = pnand %p369_p8, %p513_p9  ;;  %s374_s3 = scalar_lea.vmem %s373_s2, 64 }
  0x32   : > { %p375_p0 = scmp.lt.s32.totalorder %s178_s24, %s373_s2  ;;  %p376_p1 = scmp.lt.s32.totalorder %s374_s3, %s368_s18 }
  0x33   : > { %p371_p12 = pneg %p370_p11 }
  0x34   : > { %p377_p2 = por %p376_p1, %p375_p0 }
  0x36   : > { %p378_p3 = pnand %p377_p2, %p371_p12 }
  0x38   : > { %381 = shalt.err (!%p378_p3)
}
  0x39   : > { %s382_s9 = scalar_lea.hbm %s175_s28, 32  ;;  %s386_s12 = scalar_lea.hbm %s593_s1, 64 }
  0x3a   : > { %p383_p5 = scmp.ne.s32.totalorder %s175_s28, %s382_s9  ;;  %p387_p7 = scmp.lt.s32.totalorder %s175_s28, %s593_s1 }
  0x3b   : > { %p388_p10 = scmp.lt.s32.totalorder %s386_s12, %s382_s9 }
  0x3c   : > { %p384_p4 = pnand %p383_p5, %p513_p9 }
  0x3d   : > { %p389_p13 = por %p388_p10, %p387_p7 }
  0x3e   : > { %p385_p6 = pneg %p384_p4 }
  0x40   : > { %p390_p8 = pnand %p389_p13, %p385_p6 }
  0x42   : > { %393 = shalt.err (!%p390_p8)
}
  0x43   : > { %279 = dma.vmem_to_hbm [thread:$0]  (%p513_p9), %s178_s24, 32, %s175_s28, %s161_s29  }
  0x44 PF: > { %s189_s16 = sand.u32 1, %s428_s6   ;;  %p599_p11 = scmp.ne.s32.totalorder %s597_s21, 0 }
  0x45   : > { %p600_p12 = scmp.ge.s32.totalorder %s448_s11, 2  ;;  %s190_s17 = scalar_lea.sflag [#allocation4], %s189_s16 }
  0x47   : > { %p286_p0 = pnand %p600_p12, %p599_p11 }
  0x49   : > { %p287_p1 = pneg %p286_p0 }
  0x4b   : > { %423 = dma.done.wait (%p287_p1), %s190_s17, 32  }
  0x4c   : > { %425 = vsyncadd (%p287_p1), %s190_s17, 4294967264  ;;  %s17_s11 = sadd.s32 1, %s448_s11   ;;  %s601_s6 = smov %s432_s7 }
  0x4d   : > { %p14_p2 = scmp.ge.s32.totalorder %s17_s11, 4   ;;  %s602_s7 = smov %s436_s8 }
  0x4e   : > { %s603_s8 = smov %s518_s20  ;;  %s604_s9 = smov %s444_s10 }
  0x4f   : > { %s605_s10 = smov %s607_s14  ;;  %16 = sbr.rel (!%p14_p2) target bundleno = 6 (0x6), region = 69 }
  0x54   :  { %195 = vsyncpa [#allocation3], 1 }
  0x55   :  { %197 = vsyncpa [#allocation3 + $0x1], 1 }
  0x56   :  { %198 = vsyncpa [#allocation4], 1 }
  0x57   :  { %200 = vsyncpa [#allocation4 + $0x1], 1 }

</bundles_post_ra>
